<compile_context>
chip_gen: v5e
topology: v5e:2x2
jax: 0.10.0
libtpu: 0.0.40
codegen_flags: <defaults>
</compile_context>

<pallas_src>
import functools

import jax
import jax.numpy as jnp
from jax.experimental import pallas as pl
from jax.experimental.pallas import tpu as pltpu


def _pick_hw_tile(hw, max_tile=2048):
    """Largest HW tile that is a multiple of 128 and divides HW (or full HW)."""
    if hw <= max_tile:
        return hw
    t = (max_tile // 128) * 128
    while t >= 128:
        if hw % t == 0:
            return t
        t -= 128
    return hw


def _branch_conv_kernel(p_ref, w_ref, b_ref, y_ref, stats_ref, *, cout):
    """Dilated 3x3 convs (im2col form) for one (batch, HW-tile) block.

    p_ref:     (1, 3, 9*Cin, T)   bf16  im2col patches (T = HW tile, on lanes)
    w_ref:     (3, Cout, 9*Cin)   bf16  conv weights
    b_ref:     (3, Cout, 1)       f32   conv biases
    y_ref:     (1, 3*Cout, T)     bf16  branch outputs, lane-dense
    stats_ref: (1, 1, 3, Cout, 2) f32   per-channel partial [sum, sum of squares]
    """
    for k in range(3):                       # static python loop (unrolled)
        # Single MXU matmul per branch: (Cout, 9Cin) x (9Cin, T) -> (Cout, T) f32.
        acc = jnp.dot(w_ref[k], p_ref[0, k],
                      preferred_element_type=jnp.float32)
        acc = acc + b_ref[k]                 # (Cout, 1) broadcast over lanes

        # Partial statistics for the global (cross-batch) BGNorm: lane (XLU)
        # reductions over the dense f32 accumulator.
        stats_ref[0, 0, k, :, 0:1] = jnp.sum(acc, axis=-1, keepdims=True)
        stats_ref[0, 0, k, :, 1:2] = jnp.sum(acc * acc, axis=-1, keepdims=True)

        # Lane-dense bf16 store (T is a multiple of 128 -> unmasked stores).
        y_ref[0, k * cout:(k + 1) * cout, :] = acc.astype(y_ref.dtype)


def _norm_pool_kernel(y_ref, wp_ref, bp_ref, o_ref):
    """BGNorm (folded into weights) + branch sum + 1x1 conv as one MXU matmul.

    y_ref:  (1, 3*Cout, T) bf16
    wp_ref: (Cout, 3*Cout) bf16  a_k-scaled pool weights, branch-concatenated
    bp_ref: (Cout, 1)      f32   pool bias with folded BGNorm shift
    o_ref:  (1, Cout, T)
    """
    out = jnp.dot(wp_ref[...], y_ref[0],
                  preferred_element_type=jnp.float32) + bp_ref[...]
    o_ref[0] = out.astype(o_ref.dtype)


def aspp_forward(x, conv_w, conv_b, bn_gamma, bn_beta, pool_w, pool_b,
                 dilations=(1, 2, 3), eps=1e-5):
    """x: (B, Cin, H, W) f32.  conv_w: (3, Cout, Cin, 3, 3).  conv_b: (3, Cout).
    bn_gamma/bn_beta: (3,) (scalar affine of each BGNorm).  pool_w: (Cout, Cout).
    pool_b: (Cout,).  Returns (B, Cout, H, W)."""
    assert len(dilations) == 3
    B, Cin, H, W = x.shape
    Cout = conv_w.shape[1]
    HW = H * W
    P = max(dilations)
    K = 9 * Cin

    hw_tile = _pick_hw_tile(HW)
    n_tiles = HW // hw_tile

    # ---- glue: one reflect pad (max dilation covers every branch) + im2col, so
    # each branch conv is a single matmul.  bf16 MXU operands, f32 accumulate.
    x_pad = jnp.pad(x.astype(jnp.float32),
                    ((0, 0), (0, 0), (P, P), (P, P)), mode="reflect")
    branch_patches = []
    for d in dilations:
        taps = []
        for ky in range(3):
            for kx in range(3):
                r0 = P + (ky - 1) * d
                c0 = P + (kx - 1) * d
                taps.append(
                    x_pad[:, :, r0:r0 + H, c0:c0 + W].reshape(B, Cin, HW))
        branch_patches.append(jnp.concatenate(taps, axis=1))     # (B, 9Cin, HW)
    patches = jnp.stack(branch_patches, axis=1).astype(jnp.bfloat16)

    # conv weights -> (branch, Cout, 9*Cin), K index = (ky*3 + kx)*Cin + cin.
    w_im2col = jnp.transpose(conv_w, (0, 1, 3, 4, 2)).reshape(
        3, Cout, K).astype(jnp.bfloat16)
    b_c = conv_b.reshape(3, Cout, 1).astype(jnp.float32)

    kernel1 = functools.partial(_branch_conv_kernel, cout=Cout)
    y, stats = pl.pallas_call(
        kernel1,
        out_shape=(
            jax.ShapeDtypeStruct((B, 3 * Cout, HW), jnp.bfloat16),
            jax.ShapeDtypeStruct((B, n_tiles, 3, Cout, 2), jnp.float32),
        ),
        grid_spec=pltpu.PrefetchScalarGridSpec(
            num_scalar_prefetch=0,
            grid=(B, n_tiles),
            in_specs=[
                pl.BlockSpec((1, 3, K, hw_tile), lambda b, t: (b, 0, 0, t)),
                pl.BlockSpec((3, Cout, K), lambda b, t: (0, 0, 0)),
                pl.BlockSpec((3, Cout, 1), lambda b, t: (0, 0, 0)),
            ],
            out_specs=(
                pl.BlockSpec((1, 3 * Cout, hw_tile), lambda b, t: (b, 0, t)),
                pl.BlockSpec((1, 1, 3, Cout, 2), lambda b, t: (b, t, 0, 0, 0)),
            ),
        ),
        compiler_params=pltpu.CompilerParams(
            dimension_semantics=("parallel", "parallel"),
            vmem_limit_bytes=48 * 1024 * 1024),
    )(patches, w_im2col, b_c)

    # ---- glue: global BGNorm stats -> per-branch scalar affine (a_k, c_k),
    # folded directly into the 1x1 pool conv weights/bias.
    # TODO(synk): one-pass E[x^2] - mean^2 variance in f32; for very large or
    # strongly non-centered activations a shifted accumulation would be safer.
    n = jnp.float32(B * Cout * HW)
    s = jnp.sum(stats[..., 0], axis=(0, 1, 3))                   # (3,)
    ss = jnp.sum(stats[..., 1], axis=(0, 1, 3))                  # (3,)
    mean = s / n
    var = ss / n - mean * mean                                   # biased (training)
    a = bn_gamma.astype(jnp.float32) * jax.lax.rsqrt(var + eps)  # (3,)
    c = bn_beta.astype(jnp.float32) - mean * a                   # (3,)

    wp = pool_w.astype(jnp.float32)                              # (out, in)
    wp_eff = jnp.concatenate([a[0] * wp, a[1] * wp, a[2] * wp],
                             axis=1).astype(jnp.bfloat16)        # (Cout, 3*Cout)
    b_eff = (pool_b.astype(jnp.float32)
             + jnp.sum(c) * jnp.sum(wp, axis=1)).reshape(Cout, 1)

    out_flat = pl.pallas_call(
        _norm_pool_kernel,
        out_shape=jax.ShapeDtypeStruct((B, Cout, HW), x.dtype),
        grid_spec=pltpu.PrefetchScalarGridSpec(
            num_scalar_prefetch=0,
            grid=(B, n_tiles),
            in_specs=[
                pl.BlockSpec((1, 3 * Cout, hw_tile), lambda b, t: (b, 0, t)),
                pl.BlockSpec((Cout, 3 * Cout), lambda b, t: (0, 0)),
                pl.BlockSpec((Cout, 1), lambda b, t: (0, 0)),
            ],
            out_specs=pl.BlockSpec((1, Cout, hw_tile), lambda b, t: (b, 0, t)),
        ),
        compiler_params=pltpu.CompilerParams(
            dimension_semantics=("parallel", "parallel"),
            vmem_limit_bytes=48 * 1024 * 1024),
    )(y, wp_eff, b_eff)

    return out_flat.reshape(B, Cout, H, W)


def aspp_reference(x, conv_w, conv_b, bn_gamma, bn_beta, pool_w, pool_b,
                   dilations=(1, 2, 3), eps=1e-5):
    """Pure-JAX f32 reference matching the PyTorch module (training-mode BGNorm)."""
    branches = []
    for k, d in enumerate(dilations):
        xp = jnp.pad(x, ((0, 0), (0, 0), (d, d), (d, d)), mode="reflect")
        yk = jax.lax.conv_general_dilated(
            xp, conv_w[k], window_strides=(1, 1), padding="VALID",
            rhs_dilation=(d, d), dimension_numbers=("NCHW", "OIHW", "NCHW"))
        yk = yk + conv_b[k][None, :, None, None]
        m = jnp.mean(yk)
        v = jnp.mean(jnp.square(yk - m))
        branches.append((yk - m) / jnp.sqrt(v + eps) * bn_gamma[k] + bn_beta[k])
    z = branches[0] + branches[1] + branches[2]
    return jnp.einsum("oi,bihw->bohw", pool_w, z) + pool_b[None, :, None, None]


if __name__ == "__main__":
    key = jax.random.PRNGKey(0)
    B, Cin, Cout, H, W = 2, 4, 8, 16, 16
    dilations = (1, 2, 3)

    k_x, k_w, k_b, k_pw, k_pb = jax.random.split(key, 5)
    x = jax.random.normal(k_x, (B, Cin, H, W), dtype=jnp.float32)
    conv_w = jax.random.normal(k_w, (3, Cout, Cin, 3, 3), dtype=jnp.float32) * (
        1.0 / jnp.sqrt(Cin * 9.0))
    conv_b = jax.random.normal(k_b, (3, Cout), dtype=jnp.float32) * 0.1
    bn_gamma = jnp.ones((3,), dtype=jnp.float32)     # BatchNorm2d default init
    bn_beta = jnp.zeros((3,), dtype=jnp.float32)
    pool_w = jax.random.normal(k_pw, (Cout, Cout), dtype=jnp.float32) * (
        1.0 / jnp.sqrt(float(Cout)))
    pool_b = jax.random.normal(k_pb, (Cout,), dtype=jnp.float32) * 0.1

    # TODO(synk): BGNorm running_mean/running_var buffer updates (a training-time
    # side effect that does not change the forward output) are not modeled.
    out = aspp_forward(x, conv_w, conv_b, bn_gamma, bn_beta, pool_w, pool_b,
                       dilations)
    jax.block_until_ready(out)
    assert out.shape == (B, Cout, H, W)

    ref = aspp_reference(x, conv_w, conv_b, bn_gamma, bn_beta, pool_w, pool_b,
                         dilations)
    max_err = float(jnp.max(jnp.abs(out - ref)))
    # bf16 MXU operands + bf16 inter-pass tensor vs. an all-f32 reference:
    # expected max abs error is a few 1e-2 at these value magnitudes.
    assert jnp.allclose(out, ref, atol=7.5e-2, rtol=7.5e-2), max_err
    print("KERNEL_OK")
</pallas_src>

<mosaic_0001>
module attributes {stable_mosaic.version = 11 : i64} {
  func.func @_branch_conv_kernel(%arg0: i32, %arg1: i32, %arg2: memref<1x3x36x256xbf16, #tpu.memory_space<vmem>>, %arg3: memref<3x8x36xbf16, #tpu.memory_space<vmem>>, %arg4: memref<3x8x1xf32, #tpu.memory_space<vmem>>, %arg5: memref<1x24x256xbf16, #tpu.memory_space<vmem>>, %arg6: memref<1x1x3x8x2xf32, #tpu.memory_space<vmem>>) attributes {dimension_semantics = [#tpu.dimension_semantics<parallel>, #tpu.dimension_semantics<parallel>], iteration_bounds = array<i64: 2, 1>, scalar_prefetch = 0 : i64, scratch_operands = 0 : i64, tpu.core_type = #tpu.core_type<tc>, window_params = [{transform_indices = @transform_0, window_bounds = array<i64: 1, 3, 36, 256>}, {pipeline_mode = #tpu.pipeline_mode<synchronous>, transform_indices = @transform_1, window_bounds = array<i64: 3, 8, 36>}, {pipeline_mode = #tpu.pipeline_mode<synchronous>, transform_indices = @transform_2, window_bounds = array<i64: 3, 8, 1>}, {transform_indices = @transform_3, window_bounds = array<i64: 1, 24, 256>}, {transform_indices = @transform_4, window_bounds = array<i64: 1, 1, 3, 8, 2>}]} {
    %c0 = arith.constant 0 : index
    %c0_0 = arith.constant 0 : index
    %c0_1 = arith.constant 0 : index
    %0 = vector.load %arg3[%c0, %c0_0, %c0_1] : memref<3x8x36xbf16, #tpu.memory_space<vmem>>, vector<1x8x36xbf16>
    %1 = vector.shape_cast %0 : vector<1x8x36xbf16> to vector<8x36xbf16>
    %c0_2 = arith.constant 0 : index
    %c0_3 = arith.constant 0 : index
    %c0_4 = arith.constant 0 : index
    %c0_5 = arith.constant 0 : index
    %2 = vector.load %arg2[%c0_2, %c0_3, %c0_4, %c0_5] : memref<1x3x36x256xbf16, #tpu.memory_space<vmem>>, vector<1x1x36x256xbf16>
    %3 = vector.shape_cast %2 : vector<1x1x36x256xbf16> to vector<36x256xbf16>
    %cst = arith.constant dense<0.000000e+00> : vector<8x256xf32>
    %4 = tpu.matmul %1, %3, %cst {dimension_numbers = #tpu.dot_dimension_numbers<[1], [0], [0], [1], [0, 0, 1, 1], [], []>} : vector<8x36xbf16>, vector<36x256xbf16>, vector<8x256xf32> -> vector<8x256xf32>
    %c0_6 = arith.constant 0 : index
    %c0_7 = arith.constant 0 : index
    %c0_8 = arith.constant 0 : index
    %5 = vector.load %arg4[%c0_6, %c0_7, %c0_8] : memref<3x8x1xf32, #tpu.memory_space<vmem>>, vector<1x8x1xf32>
    %6 = vector.shape_cast %5 : vector<1x8x1xf32> to vector<8x1xf32>
    %7 = vector.broadcast %6 : vector<8x1xf32> to vector<8x256xf32>
    %8 = arith.addf %4, %7 : vector<8x256xf32>
    %cst_9 = arith.constant dense<0.000000e+00> : vector<8xf32>
    %9 = vector.multi_reduction <add>, %8, %cst_9 [1] : vector<8x256xf32> to vector<8xf32>
    %10 = vector.shape_cast %9 : vector<8xf32> to vector<8x1xf32>
    %c0_10 = arith.constant 0 : index
    %c0_11 = arith.constant 0 : index
    %c0_12 = arith.constant 0 : index
    %c0_13 = arith.constant 0 : index
    %c0_14 = arith.constant 0 : index
    %11 = vector.load %arg6[%c0_10, %c0_11, %c0_12, %c0_13, %c0_14] : memref<1x1x3x8x2xf32, #tpu.memory_space<vmem>>, vector<1x1x1x8x1xf32>
    %12 = vector.shape_cast %11 : vector<1x1x1x8x1xf32> to vector<8x1xf32>
    %13 = vector.shape_cast %10 : vector<8x1xf32> to vector<1x1x1x8x1xf32>
    tpu.vector_store %arg6[%c0_10, %c0_11, %c0_12, %c0_13, %c0_14], %13 {strides = array<i32>} : memref<1x1x3x8x2xf32, #tpu.memory_space<vmem>>, vector<1x1x1x8x1xf32>,
    %14 = arith.mulf %8, %8 : vector<8x256xf32>
    %cst_15 = arith.constant dense<0.000000e+00> : vector<8xf32>
    %15 = vector.multi_reduction <add>, %14, %cst_15 [1] : vector<8x256xf32> to vector<8xf32>
    %16 = vector.shape_cast %15 : vector<8xf32> to vector<8x1xf32>
    %c0_16 = arith.constant 0 : index
    %c0_17 = arith.constant 0 : index
    %c0_18 = arith.constant 0 : index
    %c0_19 = arith.constant 0 : index
    %c1 = arith.constant 1 : index
    %17 = vector.load %arg6[%c0_16, %c0_17, %c0_18, %c0_19, %c1] : memref<1x1x3x8x2xf32, #tpu.memory_space<vmem>>, vector<1x1x1x8x1xf32>
    %18 = vector.shape_cast %17 : vector<1x1x1x8x1xf32> to vector<8x1xf32>
    %19 = vector.shape_cast %16 : vector<8x1xf32> to vector<1x1x1x8x1xf32>
    tpu.vector_store %arg6[%c0_16, %c0_17, %c0_18, %c0_19, %c1], %19 {strides = array<i32>} : memref<1x1x3x8x2xf32, #tpu.memory_space<vmem>>, vector<1x1x1x8x1xf32>,
    %20 = arith.truncf %8 : vector<8x256xf32> to vector<8x256xbf16>
    %c0_20 = arith.constant 0 : index
    %c0_21 = arith.constant 0 : index
    %c0_22 = arith.constant 0 : index
    %21 = vector.load %arg5[%c0_20, %c0_21, %c0_22] : memref<1x24x256xbf16, #tpu.memory_space<vmem>>, vector<1x8x256xbf16>
    %22 = vector.shape_cast %21 : vector<1x8x256xbf16> to vector<8x256xbf16>
    %23 = vector.shape_cast %20 : vector<8x256xbf16> to vector<1x8x256xbf16>
    tpu.vector_store %arg5[%c0_20, %c0_21, %c0_22], %23 {strides = array<i32>} : memref<1x24x256xbf16, #tpu.memory_space<vmem>>, vector<1x8x256xbf16>,
    %c1_23 = arith.constant 1 : index
    %c0_24 = arith.constant 0 : index
    %c0_25 = arith.constant 0 : index
    %24 = vector.load %arg3[%c1_23, %c0_24, %c0_25] : memref<3x8x36xbf16, #tpu.memory_space<vmem>>, vector<1x8x36xbf16>
    %25 = vector.shape_cast %24 : vector<1x8x36xbf16> to vector<8x36xbf16>
    %c0_26 = arith.constant 0 : index
    %c1_27 = arith.constant 1 : index
    %c0_28 = arith.constant 0 : index
    %c0_29 = arith.constant 0 : index
    %26 = vector.load %arg2[%c0_26, %c1_27, %c0_28, %c0_29] : memref<1x3x36x256xbf16, #tpu.memory_space<vmem>>, vector<1x1x36x256xbf16>
    %27 = vector.shape_cast %26 : vector<1x1x36x256xbf16> to vector<36x256xbf16>
    %cst_30 = arith.constant dense<0.000000e+00> : vector<8x256xf32>
    %28 = tpu.matmul %25, %27, %cst_30 {dimension_numbers = #tpu.dot_dimension_numbers<[1], [0], [0], [1], [0, 0, 1, 1], [], []>} : vector<8x36xbf16>, vector<36x256xbf16>, vector<8x256xf32> -> vector<8x256xf32>
    %c1_31 = arith.constant 1 : index
    %c0_32 = arith.constant 0 : index
    %c0_33 = arith.constant 0 : index
    %29 = vector.load %arg4[%c1_31, %c0_32, %c0_33] : memref<3x8x1xf32, #tpu.memory_space<vmem>>, vector<1x8x1xf32>
    %30 = vector.shape_cast %29 : vector<1x8x1xf32> to vector<8x1xf32>
    %31 = vector.broadcast %30 : vector<8x1xf32> to vector<8x256xf32>
    %32 = arith.addf %28, %31 : vector<8x256xf32>
    %cst_34 = arith.constant dense<0.000000e+00> : vector<8xf32>
    %33 = vector.multi_reduction <add>, %32, %cst_34 [1] : vector<8x256xf32> to vector<8xf32>
    %34 = vector.shape_cast %33 : vector<8xf32> to vector<8x1xf32>
    %c0_35 = arith.constant 0 : index
    %c0_36 = arith.constant 0 : index
    %c1_37 = arith.constant 1 : index
    %c0_38 = arith.constant 0 : index
    %c0_39 = arith.constant 0 : index
    %35 = vector.load %arg6[%c0_35, %c0_36, %c1_37, %c0_38, %c0_39] : memref<1x1x3x8x2xf32, #tpu.memory_space<vmem>>, vector<1x1x1x8x1xf32>
    %36 = vector.shape_cast %35 : vector<1x1x1x8x1xf32> to vector<8x1xf32>
    %37 = vector.shape_cast %34 : vector<8x1xf32> to vector<1x1x1x8x1xf32>
    tpu.vector_store %arg6[%c0_35, %c0_36, %c1_37, %c0_38, %c0_39], %37 {strides = array<i32>} : memref<1x1x3x8x2xf32, #tpu.memory_space<vmem>>, vector<1x1x1x8x1xf32>,
    %38 = arith.mulf %32, %32 : vector<8x256xf32>
    %cst_40 = arith.constant dense<0.000000e+00> : vector<8xf32>
    %39 = vector.multi_reduction <add>, %38, %cst_40 [1] : vector<8x256xf32> to vector<8xf32>
    %40 = vector.shape_cast %39 : vector<8xf32> to vector<8x1xf32>
    %c0_41 = arith.constant 0 : index
    %c0_42 = arith.constant 0 : index
    %c1_43 = arith.constant 1 : index
    %c0_44 = arith.constant 0 : index
    %c1_45 = arith.constant 1 : index
    %41 = vector.load %arg6[%c0_41, %c0_42, %c1_43, %c0_44, %c1_45] : memref<1x1x3x8x2xf32, #tpu.memory_space<vmem>>, vector<1x1x1x8x1xf32>
    %42 = vector.shape_cast %41 : vector<1x1x1x8x1xf32> to vector<8x1xf32>
    %43 = vector.shape_cast %40 : vector<8x1xf32> to vector<1x1x1x8x1xf32>
    tpu.vector_store %arg6[%c0_41, %c0_42, %c1_43, %c0_44, %c1_45], %43 {strides = array<i32>} : memref<1x1x3x8x2xf32, #tpu.memory_space<vmem>>, vector<1x1x1x8x1xf32>,
    %44 = arith.truncf %32 : vector<8x256xf32> to vector<8x256xbf16>
    %c0_46 = arith.constant 0 : index
    %c8 = arith.constant 8 : index
    %c0_47 = arith.constant 0 : index
    %45 = vector.load %arg5[%c0_46, %c8, %c0_47] : memref<1x24x256xbf16, #tpu.memory_space<vmem>>, vector<1x8x256xbf16>
    %46 = vector.shape_cast %45 : vector<1x8x256xbf16> to vector<8x256xbf16>
    %47 = vector.shape_cast %44 : vector<8x256xbf16> to vector<1x8x256xbf16>
    tpu.vector_store %arg5[%c0_46, %c8, %c0_47], %47 {strides = array<i32>} : memref<1x24x256xbf16, #tpu.memory_space<vmem>>, vector<1x8x256xbf16>,
    %c2 = arith.constant 2 : index
    %c0_48 = arith.constant 0 : index
    %c0_49 = arith.constant 0 : index
    %48 = vector.load %arg3[%c2, %c0_48, %c0_49] : memref<3x8x36xbf16, #tpu.memory_space<vmem>>, vector<1x8x36xbf16>
    %49 = vector.shape_cast %48 : vector<1x8x36xbf16> to vector<8x36xbf16>
    %c0_50 = arith.constant 0 : index
    %c2_51 = arith.constant 2 : index
    %c0_52 = arith.constant 0 : index
    %c0_53 = arith.constant 0 : index
    %50 = vector.load %arg2[%c0_50, %c2_51, %c0_52, %c0_53] : memref<1x3x36x256xbf16, #tpu.memory_space<vmem>>, vector<1x1x36x256xbf16>
    %51 = vector.shape_cast %50 : vector<1x1x36x256xbf16> to vector<36x256xbf16>
    %cst_54 = arith.constant dense<0.000000e+00> : vector<8x256xf32>
    %52 = tpu.matmul %49, %51, %cst_54 {dimension_numbers = #tpu.dot_dimension_numbers<[1], [0], [0], [1], [0, 0, 1, 1], [], []>} : vector<8x36xbf16>, vector<36x256xbf16>, vector<8x256xf32> -> vector<8x256xf32>
    %c2_55 = arith.constant 2 : index
    %c0_56 = arith.constant 0 : index
    %c0_57 = arith.constant 0 : index
    %53 = vector.load %arg4[%c2_55, %c0_56, %c0_57] : memref<3x8x1xf32, #tpu.memory_space<vmem>>, vector<1x8x1xf32>
    %54 = vector.shape_cast %53 : vector<1x8x1xf32> to vector<8x1xf32>
    %55 = vector.broadcast %54 : vector<8x1xf32> to vector<8x256xf32>
    %56 = arith.addf %52, %55 : vector<8x256xf32>
    %cst_58 = arith.constant dense<0.000000e+00> : vector<8xf32>
    %57 = vector.multi_reduction <add>, %56, %cst_58 [1] : vector<8x256xf32> to vector<8xf32>
    %58 = vector.shape_cast %57 : vector<8xf32> to vector<8x1xf32>
    %c0_59 = arith.constant 0 : index
    %c0_60 = arith.constant 0 : index
    %c2_61 = arith.constant 2 : index
    %c0_62 = arith.constant 0 : index
    %c0_63 = arith.constant 0 : index
    %59 = vector.load %arg6[%c0_59, %c0_60, %c2_61, %c0_62, %c0_63] : memref<1x1x3x8x2xf32, #tpu.memory_space<vmem>>, vector<1x1x1x8x1xf32>
    %60 = vector.shape_cast %59 : vector<1x1x1x8x1xf32> to vector<8x1xf32>
    %61 = vector.shape_cast %58 : vector<8x1xf32> to vector<1x1x1x8x1xf32>
    tpu.vector_store %arg6[%c0_59, %c0_60, %c2_61, %c0_62, %c0_63], %61 {strides = array<i32>} : memref<1x1x3x8x2xf32, #tpu.memory_space<vmem>>, vector<1x1x1x8x1xf32>,
    %62 = arith.mulf %56, %56 : vector<8x256xf32>
    %cst_64 = arith.constant dense<0.000000e+00> : vector<8xf32>
    %63 = vector.multi_reduction <add>, %62, %cst_64 [1] : vector<8x256xf32> to vector<8xf32>
    %64 = vector.shape_cast %63 : vector<8xf32> to vector<8x1xf32>
    %c0_65 = arith.constant 0 : index
    %c0_66 = arith.constant 0 : index
    %c2_67 = arith.constant 2 : index
    %c0_68 = arith.constant 0 : index
    %c1_69 = arith.constant 1 : index
    %65 = vector.load %arg6[%c0_65, %c0_66, %c2_67, %c0_68, %c1_69] : memref<1x1x3x8x2xf32, #tpu.memory_space<vmem>>, vector<1x1x1x8x1xf32>
    %66 = vector.shape_cast %65 : vector<1x1x1x8x1xf32> to vector<8x1xf32>
    %67 = vector.shape_cast %64 : vector<8x1xf32> to vector<1x1x1x8x1xf32>
    tpu.vector_store %arg6[%c0_65, %c0_66, %c2_67, %c0_68, %c1_69], %67 {strides = array<i32>} : memref<1x1x3x8x2xf32, #tpu.memory_space<vmem>>, vector<1x1x1x8x1xf32>,
    %68 = arith.truncf %56 : vector<8x256xf32> to vector<8x256xbf16>
    %c0_70 = arith.constant 0 : index
    %c16 = arith.constant 16 : index
    %c0_71 = arith.constant 0 : index
    %69 = vector.load %arg5[%c0_70, %c16, %c0_71] : memref<1x24x256xbf16, #tpu.memory_space<vmem>>, vector<1x8x256xbf16>
    %70 = vector.shape_cast %69 : vector<1x8x256xbf16> to vector<8x256xbf16>
    %71 = vector.shape_cast %68 : vector<8x256xbf16> to vector<1x8x256xbf16>
    tpu.vector_store %arg5[%c0_70, %c16, %c0_71], %71 {strides = array<i32>} : memref<1x24x256xbf16, #tpu.memory_space<vmem>>, vector<1x8x256xbf16>,
    return
  }
  func.func @transform_0(%arg0: i32, %arg1: i32) -> (i32, i32, i32, i32) {
    %c0_i32 = arith.constant 0 : i32
    %c0_i32_0 = arith.constant 0 : i32
    %c0_i32_1 = arith.constant 0 : i32
    return %arg0, %c0_i32, %c0_i32_0, %arg1 : i32, i32, i32, i32
  }
  func.func @transform_1(%arg0: i32, %arg1: i32) -> (i32, i32, i32) {
    %c0_i32 = arith.constant 0 : i32
    %c0_i32_0 = arith.constant 0 : i32
    %c0_i32_1 = arith.constant 0 : i32
    %c0_i32_2 = arith.constant 0 : i32
    return %c0_i32, %c0_i32_0, %c0_i32_1 : i32, i32, i32
  }
  func.func @transform_2(%arg0: i32, %arg1: i32) -> (i32, i32, i32) {
    %c0_i32 = arith.constant 0 : i32
    %c0_i32_0 = arith.constant 0 : i32
    %c0_i32_1 = arith.constant 0 : i32
    %c0_i32_2 = arith.constant 0 : i32
    return %c0_i32, %c0_i32_0, %c0_i32_1 : i32, i32, i32
  }
  func.func @transform_3(%arg0: i32, %arg1: i32) -> (i32, i32, i32) {
    %c0_i32 = arith.constant 0 : i32
    %c0_i32_0 = arith.constant 0 : i32
    return %arg0, %c0_i32, %arg1 : i32, i32, i32
  }
  func.func @transform_4(%arg0: i32, %arg1: i32) -> (i32, i32, i32, i32, i32) {
    %c0_i32 = arith.constant 0 : i32
    %c0_i32_0 = arith.constant 0 : i32
    %c0_i32_1 = arith.constant 0 : i32
    %c0_i32_2 = arith.constant 0 : i32
    return %arg0, %arg1, %c0_i32, %c0_i32_0, %c0_i32_1 : i32, i32, i32, i32, i32
  }
}

</mosaic_0001>

<bundles_post_ra>
// kernel: tpu_custom_call.1
= control target key start
LH: loop header
LB: loop body
LE: loop exit
PB: predicated region body
PF: predicated region fallthrough
CT: control target
= control target key end

     0   :  { %10 = vsyncpa [#allocation3], 0  ;;  %s1104_s0 = inlined_call_operand.vmem [shape: bf16[2,3,36,256], index: 0, kind: input, shape index: {}]   ;;  %s1105_s1 = inlined_call_operand.vmem [shape: bf16[3,8,36], index: 1, kind: input, shape index: {}]   ;;  %s1106_s2 = inlined_call_operand.vmem [shape: f32[3,8,1], index: 2, kind: input, shape index: {}]   ;;  %s1107_s3 = inlined_call_operand.hbm [shape: bf16[2,24,256], index: 3, kind: output, shape index: {0}]   ;;  %s1108_s4 = inlined_call_operand.vmem [shape: f32[2,1,3,8,2], index: 4, kind: output, shape index: {1}]  }
   0x1   :  { %12 = vsyncpa [#allocation3 + $0x1], 0  ;;  %s931_s15 = smov 0   ;;  %s933_s16 = smov 0  }
   0x2   :  { %s935_s17 = smov 0   ;;  %s937_s18 = smov 0  }
   0x3   :  { %s939_s19 = smov 0   ;;  %s941_s20 = smov 0  }
   0x4 LB: > { %s665_s21 = sadd.s32 4294967295, %s901_s20   ;;  %s666_s22 = sadd.s32 4294967294, %s901_s20   ;;  %s901_s20 = sphi %s941_s20, %s18_s20   ;;  %s897_s19 = sphi %s939_s19, %s1115_s19   ;;  %s893_s18 = sphi %s937_s18, %s1114_s18   ;;  %s889_s17 = sphi %s935_s17, %s1113_s17   ;;  %s885_s16 = sphi %s933_s16, %s1112_s16   ;;  %s881_s15 = sphi %s931_s15, %s1111_s15  }
   0x5   : > { %s30_s23 = sadd.s32 1, %s897_s19  ;;  %s109_s24 = sadd.s32 1, %s889_s17 }
   0x6   : > { %p32_p0 = scmp.ge.s32.totalorder %s30_s23, 2  ;;  %p119_p1 = scmp.ne.s32.totalorder %s889_s17, %s885_s16 }
   0x7   : > { %p120_p2 = scmp.eq.s32.totalorder %s665_s21, 1  ;;  %p125_p3 = scmp.ne.s32.totalorder %s885_s16, %s881_s15 }
   0x8   : > { %s1117_s23 = smov (%p32_p0, %s30_s23), 0  ;;  %p126_p5 = scmp.eq.s32.totalorder %s666_s22, 1 }
   0x9   : > { %p971_p4 = por %p120_p2, %p119_p1  ;;  %s104_s26 = ssub.s32 %s897_s19, %s1117_s23 }
   0xa   : > { %p669_p6 = scmp.ge.s32.totalorder %s901_s20, 1  ;;  %p107_p7 = scmp.eq.s32.totalorder %s104_s26, 0 }
   0xb   : > { %p978_p8 = por %p126_p5, %p125_p3  ;;  %p191_p9 = scmp.lt.s32.totalorder %s901_s20, 3 }
   0xc   : > { %s984_s28 = scalar_select %p107_p7, %s889_s17, %s109_s24  }
   0xd   : > { %p192_p10 = pnand %p669_p6, %p191_p9 }
   0xe   : > { %p231_p11 = scmp.lt.s32.totalorder (!%p192_p10), %s893_s18, 1  ;;  %s216_s30 = sand.u32 (!%p192_p10), 1, %s885_s16  }
   0xf   : > { %195 = sbr.rel (%p192_p10) target bundleno = 316 (0x13c), region = 32  ;;  %s516_s14 = scalar_lea.sflag (!%p192_p10), [#allocation3], %s216_s30 }
  0x10   : > { %s843_s26 = scalar_lea.hbm (!%p192_p10), %s1107_s3, 48 }
  0x14   : > { %v903_v0 = vmov 0   ;;  %v257_v1 = vld [vmem:[%s1106_s2] sm:$0xff]  ;;  %s991_s5 = scalar_select %p231_p11, %s893_s18, 1  ;;  %v696_v4 = vld [vmem:[%s1106_s2 + $0x8] sm:$0xff]  ;;  %vm292_vm0 = vcmask 1041408   ;;  %v723_v42 = vld [vmem:[%s1106_s2 + $0x10] sm:$0xff] }
  0x15   : > { %821 = vset.pattern.permute.xlu0 %v903_v0  ;;  %822 = vset.pattern.permute.xlu1 %v903_v0  ;;  %v251_v53 = vld [vmem:[%s1105_s1] sm:$0xf]  ;;  %vm288_vm1 = vcmask 293888   ;;  %v690_v54 = vld [vmem:[%s1105_s1 + $0x4] sm:$0xf] }
  0x16   : > { %260 = vperm.xlu0 %821, %v257_v1   ;;  %s760_s6 = smul.u32 120, %s991_s5  ;;  %439 = vperm.xlu1 %822, %v723_v42   ;;  %v717_v63 = vld [vmem:[%s1105_s1 + $0x8] sm:$0xf] }
  0x18   : > { %s997_s9 = scalar_lea.vmem %s1104_s0, %s760_s6  ;;  %s759_s6 = smul.u32 24, %s216_s30 }
  0x19   : > { %v256_v2 = vld [vmem:[%s997_s9 + $0x20] sm:$0x33]  ;;  %v695_v3 = vld [vmem:[%s997_s9 + $0x48] sm:$0x33]  ;;  %v682_v9 = vld [vmem:[%s997_s9 + $0x10] sm:$0xf] }
  0x1a   : > { %v276_v5 = vunpack.c.l.b16 %v256_v2  ;;  %v277_v6 = vunpack.c.h.b16 %v256_v2  ;;  %v367_v7 = vunpack.c.l.b16 %v695_v3  ;;  %v368_v8 = vunpack.c.h.b16 %v695_v3  ;;  %v750_v10 = vld [vmem:[%s997_s9 + $0x14] sm:$0xf0]  ;;  %v749_v15 = vld [vmem:[%s997_s9 + $0x14] sm:$0xf]  ;;  %v684_v16 = vld [vmem:[%s997_s9 + $0x18] sm:$0xf0] }
  0x1b   : > { %v707_v17 = vld [vmem:[%s997_s9 + $0x38] sm:$0xf]  ;;  %v754_v18 = vld [vmem:[%s997_s9 + $0x3c] sm:$0xf0]  ;;  %v753_v19 = vld [vmem:[%s997_s9 + $0x3c] sm:$0xf]  ;;  %v683_v25 = vor.u32 %v750_v10, %v682_v9  ;;  %v687_v26 = vor.u32 %v749_v15, %v684_v16 }
  0x1c   : > { %v282_v11 = vpack.c.b16 %v276_v5, %v276_v5  ;;  %v283_v12 = vpack.c.b16 %v277_v6, %v277_v6  ;;  %v373_v13 = vpack.c.b16 %v367_v7, %v367_v7  ;;  %v374_v14 = vpack.c.b16 %v368_v8, %v368_v8  ;;  %v709_v20 = vld [vmem:[%s997_s9 + $0x40] sm:$0xf0]  ;;  %v674_v27 = vld [vmem:[%s997_s9] sm:$0xf]  ;;  %v748_v28 = vld [vmem:[%s997_s9 + $0x4] sm:$0xf0] }
  0x1d   : > { %v722_v29 = vld [vmem:[%s997_s9 + $0x70] sm:$0x33]  ;;  %v708_v30 = vor.u32 %v754_v18, %v707_v17  ;;  %v712_v31 = vor.u32 %v753_v19, %v709_v20  ;;  %v747_v32 = vld [vmem:[%s997_s9 + $0x4] sm:$0xf]  ;;  %v676_v33 = vld [vmem:[%s997_s9 + $0x8] sm:$0xf0]  ;;  %v675_v43 = vor.u32 %v748_v28, %v674_v27 }
  0x1e   : > { %351 = vperm.xlu0 %821, %v696_v4   ;;  %v294_v21 = vsel %vm292_vm0, %v282_v11, 0  ;;  %v297_v22 = vsel %vm292_vm0, %v283_v12, 0  ;;  %v383_v23 = vsel %vm292_vm0, %v373_v13, 0  ;;  %v386_v24 = vsel %vm292_vm0, %v374_v14, 0  ;;  %v699_v34 = vld [vmem:[%s997_s9 + $0x28] sm:$0xf] }
  0x1f   : > { %304 = vmatpush.bf16.msra.mxu0 %v294_v21  ;;  %317 = vmatpush.bf16.msra.mxu1 %v297_v22  ;;  %v455_v35 = vunpack.c.l.b16 %v722_v29  ;;  %v456_v36 = vunpack.c.h.b16 %v722_v29  ;;  %v752_v37 = vld [vmem:[%s997_s9 + $0x2c] sm:$0xf0]  ;;  %v751_v38 = vld [vmem:[%s997_s9 + $0x2c] sm:$0xf]  ;;  %v701_v39 = vld [vmem:[%s997_s9 + $0x30] sm:$0xf0]  ;;  %v679_v44 = vor.u32 %v747_v32, %v676_v33 }
  0x20   : > { %393 = vmatpush.bf16.msra.mxu2 %v383_v23  ;;  %406 = vmatpush.bf16.msra.mxu3 %v386_v24  ;;  %v700_v45 = vor.u32 %v752_v37, %v699_v34  ;;  %v704_v46 = vor.u32 %v751_v38, %v701_v39  ;;  %v734_v47 = vld [vmem:[%s997_s9 + $0x60] sm:$0xf]  ;;  %v758_v48 = vld [vmem:[%s997_s9 + $0x64] sm:$0xf0]  ;;  %v757_v51 = vld [vmem:[%s997_s9 + $0x64] sm:$0xf] }
  0x21   : > { %v461_v40 = vpack.c.b16 %v455_v35, %v455_v35  ;;  %v462_v41 = vpack.c.b16 %v456_v36, %v456_v36  ;;  %v736_v52 = vld [vmem:[%s997_s9 + $0x68] sm:$0xf0]  ;;  %v735_v55 = vor.u32 %v758_v48, %v734_v47  ;;  %v726_v57 = vld [vmem:[%s997_s9 + $0x50] sm:$0xf]  ;;  %v756_v58 = vld [vmem:[%s997_s9 + $0x54] sm:$0xf0] }
  0x22   : > { %v739_v56 = vor.u32 %v757_v51, %v736_v52  ;;  %v755_v59 = vld [vmem:[%s997_s9 + $0x54] sm:$0xf]  ;;  %v728_v60 = vld [vmem:[%s997_s9 + $0x58] sm:$0xf0]  ;;  %v727_v61 = vor.u32 %v756_v58, %v726_v57  ;;  %s1056_s7 = scalar_lea.vmem [#allocation2], %s759_s6  ;;  %s762_s9 = smul.u32 24, %s893_s18 }
  0x23   : > { %305 = vmatpush.bf16.msra.mxu0 %v683_v25  ;;  %318 = vmatpush.bf16.msra.mxu1 %v687_v26  ;;  %v471_v49 = vsel %vm292_vm0, %v461_v40, 0  ;;  %v474_v50 = vsel %vm292_vm0, %v462_v41, 0  ;;  %v731_v62 = vor.u32 %v755_v59, %v728_v60  ;;  %s539_s8 = sshll.u32 %s1056_s7, 4  ;;  %s540_s8 = int_to_ptr.vmem [resolvable:$true] %s539_s8 }
  0x24   : > { %394 = vmatpush.bf16.msra.mxu2 %v708_v30  ;;  %407 = vmatpush.bf16.msra.mxu3 %v712_v31  ;;  %s538_s12 = scalar_lea.hbm %s1107_s3, %s762_s9 }
  0x25   : > { %s541_s13 = sshll.u32 %s538_s12, 4  ;;  %s542_s13 = int_to_ptr.hbm [resolvable:$true] %s541_s13 }
  0x26   : > { %s837_s21 = sshra.s32 %s542_s13, 4  ;;  %s838_s21 = int_to_ptr.hbm [resolvable:$true] %s837_s21 }
  0x27   : > { %306 = vmatpush.bf16.msra.mxu0 %v675_v43  ;;  %319 = vmatpush.bf16.msra.mxu1 %v679_v44  ;;  %s839_s18 = scalar_lea.hbm %s838_s21, 24  ;;  %p844_p1 = scmp.lt.s32.totalorder %s838_s21, %s1107_s3 }
  0x28   : > { %395 = vmatpush.bf16.msra.mxu2 %v700_v45  ;;  %408 = vmatpush.bf16.msra.mxu3 %v704_v46  ;;  %p840_p12 = scmp.ne.s32.totalorder %s838_s21, %s839_s18  ;;  %p845_p2 = scmp.lt.s32.totalorder %s843_s26, %s839_s18 }
  0x2a   : > { %688 = vmatmul.msk.bf16.vlgmr.msra.gmra.mxu0 %vm288_vm1, %v251_v53  ;;  %689 = vmatmul.msk.bf16.vlgmr.msra.gmra.mxu1 %vm288_vm1, %v251_v53  ;;  %p841_p13 = pnand %p840_p12, %p971_p4  ;;  %p846_p3 = por %p845_p2, %p844_p1 }
  0x2b   : > { %481 = vmatpush.bf16.msrb.mxu0 %v471_v49  ;;  %494 = vmatpush.bf16.msrb.mxu1 %v474_v50 }
  0x2c   : > { %713 = vmatmul.msk.bf16.vlgmr.msra.gmra.mxu2 %vm288_vm1, %v690_v54  ;;  %714 = vmatmul.msk.bf16.vlgmr.msra.gmra.mxu3 %vm288_vm1, %v690_v54  ;;  %p842_p0 = pneg %p841_p13 }
  0x2e   : > { %p847_p5 = pnand %p846_p3, %p842_p0 }
  0x2f   : > { %482 = vmatpush.bf16.msrb.mxu0 %v735_v55  ;;  %495 = vmatpush.bf16.msrb.mxu1 %v739_v56 }
  0x33   : > { %483 = vmatpush.bf16.msrb.mxu0 %v727_v61  ;;  %496 = vmatpush.bf16.msrb.mxu1 %v731_v62 }
  0x3a   : > { %740 = vmatmul.msk.bf16.vlgmr.msrb.gmra.mxu0 %vm288_vm1, %v717_v63  ;;  %741 = vmatmul.msk.bf16.vlgmr.msrb.gmra.mxu1 %vm288_vm1, %v717_v63 }
  0x88   : > { %v261_v0 = vpop.permute.xlu0 %260  ;;  %v440_v22 = vpop.permute.xlu1 %439 }
  0x90   : > { %v352_v10 = vpop.permute.xlu0 %351 }
  0xa7   : > { %v308_v1 = vpop.f32.mrf.mxu0  ;;  %v321_v2 = vpop.f32.mrf.mxu1 }
  0xa8   : > { %v309_v3 = vadd.f32 %v308_v1, %v261_v0  ;;  %v322_v4 = vadd.f32 %v321_v2, %v261_v0 }
  0xaa   : > { %v337_v5 = vpack.c.bf16 %v322_v4, %v309_v3  ;;  %v325_v6 = vadd.f32 %v322_v4, %v309_v3  ;;  %v330_v7 = vmul.f32 %v309_v3, %v309_v3  ;;  %v331_v8 = vmul.f32 %v322_v4, %v322_v4 }
  0xac   : > { %338 = vst [vmem:[%s1056_s7] sm:$0xff] %v337_v5  ;;  %326 = vadd.xlane.f32.xlu1 %v325_v6  ;;  %v332_v9 = vadd.f32 %v331_v8, %v330_v7 }
  0xae   : > { %333 = vadd.xlane.f32.xlu2 %v332_v9 }
  0xaf   : > { %v397_v11 = vpop.f32.mrf.mxu2  ;;  %v410_v12 = vpop.f32.mrf.mxu3 }
  0xb0   : > { %v398_v13 = vadd.f32 %v397_v11, %v352_v10  ;;  %v411_v14 = vadd.f32 %v410_v12, %v352_v10  ;;  %v310_v15 = vpop.f32.mrf.mxu0  ;;  %v323_v16 = vpop.f32.mrf.mxu1 }
  0xb2   : > { %v425_v17 = vpack.c.bf16 %v411_v14, %v398_v13  ;;  %v419_v18 = vmul.f32 %v398_v13, %v398_v13  ;;  %v420_v19 = vmul.f32 %v411_v14, %v411_v14  ;;  %v414_v21 = vadd.f32 %v411_v14, %v398_v13 }
  0xb4   : > { %426 = vst [vmem:[%s1056_s7 + $0x8] sm:$0xff] %v425_v17  ;;  %v421_v20 = vadd.f32 %v420_v19, %v419_v18 }
  0xb6   : > { %422 = vadd.xlane.f32.xlu0 %v421_v20  ;;  %415 = vadd.xlane.f32.xlu2 %v414_v21 }
  0xb7   : > { %v399_v23 = vpop.f32.mrf.mxu2  ;;  %v412_v24 = vpop.f32.mrf.mxu3 }
  0xb8   : > { %v485_v25 = vpop.f32.mrf.mxu0  ;;  %v498_v26 = vpop.f32.mrf.mxu1 }
  0xb9   : > { %v486_v27 = vadd.f32 %v485_v25, %v440_v22  ;;  %v499_v28 = vadd.f32 %v498_v26, %v440_v22 }
  0xbb   : > { %v513_v29 = vpack.c.bf16 %v499_v28, %v486_v27  ;;  %v502_v30 = vadd.f32 %v499_v28, %v486_v27 }
  0xbd   : > { %514 = vst [vmem:[%s1056_s7 + $0x10] sm:$0xff] %v513_v29 }
  0xbe   : > { %850 = shalt.err (!%p847_p5)
}
  0xbf   : > { %s904_s30 = smov 128   ;;  %s905_s7 = smov 8   ;;  %503 = vadd.xlane.f32.xlu2 %v502_v30  ;;  %v507_v33 = vmul.f32 %v486_v27, %v486_v27  ;;  %v508_v34 = vmul.f32 %v499_v28, %v499_v28  ;;  %vm328_vm2 = vcmask 7168   ;;  %vm335_vm3 = vcmask 15368  }
  0xc0   : > { %763 = dma.vmem_to_hbm [thread:$0]  (%p971_p4), %s540_s8, 384, %s542_s13, %s516_s14, %s904_s30, %s904_s30, %s905_s7   ;;  %v487_v31 = vpop.f32.mrf.mxu0  ;;  %v500_v32 = vpop.f32.mrf.mxu1 }
  0xc1   : > { %v509_v35 = vadd.f32 %v508_v34, %v507_v33  ;;  %s761_s9 = smul.u32 24, %s991_s5 }
  0xc3   : > { %s249_s12 = scalar_lea.vmem %s1108_s4, %s761_s9 }
  0xc7   : > { %510 = vadd.xlane.f32.xlu2 %v509_v35 }
 0x11f   : > { %v327_v36 = vpop.xlane.xlu1 %326 }
 0x120   : > { %329 = vst.msk [vmem:[%s249_s12] sm:$0xff] %vm328_vm2, %v327_v36 }
 0x121   : > { %v334_v37 = vpop.xlane.xlu2 %333 }
 0x122   : > { %336 = vst.msk [vmem:[%s249_s12] sm:$0xff] %vm335_vm3, %v334_v37 }
 0x129   : > { %v416_v38 = vpop.xlane.xlu2 %415  ;;  %v423_v39 = vpop.xlane.xlu0 %422 }
 0x12a   : > { %715 = vst.msk [vmem:[%s249_s12 + $0x8] sm:$0xff] %vm328_vm2, %v416_v38 }
 0x12b   : > { %716 = vst.msk [vmem:[%s249_s12 + $0x8] sm:$0xff] %vm335_vm3, %v423_v39 }
 0x132   : > { %v504_v40 = vpop.xlane.xlu2 %503 }
 0x133   : > { %742 = vst.msk [vmem:[%s249_s12 + $0x10] sm:$0xff] %vm328_vm2, %v504_v40 }
 0x13a   : > { %v511_v41 = vpop.xlane.xlu2 %510 }
 0x13b   : > { %743 = vst.msk [vmem:[%s249_s12 + $0x10] sm:$0xff] %vm335_vm3, %v511_v41 }
 0x13c PF: > { %p769_p4 = scmp.ge.s32.totalorder %s901_s20, 2  ;;  %s559_s25 = sand.u32 1, %s881_s15  }
 0x13d   : > { %s560_s5 = scalar_lea.sflag [#allocation3], %s559_s25 }
 0x13e   : > { %p766_p6 = pnand %p769_p4, %p978_p8 }
 0x140   : > { %p767_p7 = pneg %p766_p6 }
 0x142   : > { %876 = dma.done.wait (%p767_p7), %s560_s5, 384  }
 0x143   : > { %878 = vsyncadd (%p767_p7), %s560_s5, 4294966912  ;;  %s18_s20 = sadd.s32 1, %s901_s20   ;;  %s1111_s15 = smov %s885_s16 }
 0x144   : > { %p15_p9 = scmp.ge.s32.totalorder %s18_s20, 4   ;;  %s1112_s16 = smov %s889_s17 }
 0x145   : > { %s1113_s17 = smov %s984_s28  ;;  %s1114_s18 = smov %s897_s19 }
 0x146   : > { %s1115_s19 = smov %s1117_s23  ;;  %17 = sbr.rel (!%p15_p9) target bundleno = 4 (0x4), region = 87 }
 0x14b   :  { %578 = vsyncpa [#allocation3], 1 }
 0x14c   :  { %580 = vsyncpa [#allocation3 + $0x1], 1 }

</bundles_post_ra>
